<compile_context>
chip_gen: v6e
topology: v6e:2x2x1
jax: 0.10.0
libtpu: 0.0.40
codegen_flags: <defaults>
</compile_context>

<pallas_src>
import math

import jax
import jax.numpy as jnp
from jax.experimental import pallas as pl
from jax.experimental.pallas import tpu as pltpu

_BN_EPS = 1e-5
_BN_SCALE = 1.0 / math.sqrt(1.0 + _BN_EPS)
_LANE = 128


def _round_up(x, m):
    return ((x + m - 1) // m) * m


# ----------------------------------------------------------------------------
# Pallas kernels
# ----------------------------------------------------------------------------
def _mm_bias_relu_kernel(x_ref, w_ref, b_ref, o_ref):
    """relu((M, K) @ (K, N) + bias).  bf16 operands, f32 accumulate/epilogue."""
    acc = jnp.dot(x_ref[...], w_ref[...], preferred_element_type=jnp.float32)
    o_ref[...] = jnp.maximum(acc + b_ref[...], 0.0).astype(o_ref.dtype)


def _make_conv3x3_kernel(block_tiles, wp, cin_p, m_rows, data_rows, buf_rows):
    """3x3 conv (pad=1) + bias + ReLU for one (batch, row-block) grid step.

    The padded image stays in HBM flattened as (rows = y*(W+2)+x, Cin_p); tap
    (kh, kw) is then the contiguous row-slice at offset kh*(W+2)+kw of the
    halo block sitting in VMEM.  Each of the `block_tiles` row tiles is
    processed with a double-buffered halo DMA and 9 accumulating MXU matmuls
    (f32 accumulation, BN scale pre-folded into the weights).  The 2
    over-computed columns per image row are discarded by the wrapper.
    """

    def kernel(x_hbm, w_ref, b_ref, o_ref, xbuf, sems):
        b = pl.program_id(0)
        base = pl.program_id(1) * (block_tiles * m_rows)

        def halo_copy(t, slot):
            return pltpu.make_async_copy(
                x_hbm.at[b, pl.ds(base + t * m_rows, data_rows)],
                xbuf.at[slot, pl.ds(0, data_rows)],
                sems.at[slot])

        # Zero the alignment tail once per row-block; it is only read by the
        # (discarded) over-computed columns of the last image row of a tile.
        tail = buf_rows - data_rows
        if tail:
            xbuf[:, data_rows:buf_rows, :] = jnp.zeros(
                (2, tail, cin_p), xbuf.dtype)

        halo_copy(0, 0).start()                 # prime the pipeline
        bias = b_ref[...]

        for t in range(block_tiles):            # static unroll
            slot = t & 1
            if t + 1 < block_tiles:             # prefetch next halo row-block
                halo_copy(t + 1, 1 - slot).start()
            halo_copy(t, slot).wait()           # wait for the current one

            acc = None
            for kh in range(3):
                for kw in range(3):
                    tap = xbuf[slot, kh * wp + kw: kh * wp + kw + m_rows, :]
                    d = jnp.dot(tap, w_ref[kh * 3 + kw],
                                preferred_element_type=jnp.float32)
                    acc = d if acc is None else acc + d
            y = jnp.maximum(acc + bias, 0.0).astype(o_ref.dtype)
            o_ref[t * m_rows:(t + 1) * m_rows, :] = y

    return kernel


# ----------------------------------------------------------------------------
# Pallas wrappers
# ----------------------------------------------------------------------------
def fused_stage_conv1x1(rows_bf16, w_bf16, bias_f32):
    """All pyramid-stage 1x1 convs as one matmul: (M, Cin_p) @ (Cin_p, S*out)."""
    m, k = rows_bf16.shape
    cout_p = w_bf16.shape[1]
    return pl.pallas_call(
        _mm_bias_relu_kernel,
        out_shape=jax.ShapeDtypeStruct((m, cout_p), jnp.float32),
        grid=(1,),
        in_specs=[pl.BlockSpec((m, k), lambda i: (0, 0)),
                  pl.BlockSpec((k, cout_p), lambda i: (0, 0)),
                  pl.BlockSpec((1, cout_p), lambda i: (0, 0))],
        out_specs=pl.BlockSpec((m, cout_p), lambda i: (0, 0)),
    )(rows_bf16, w_bf16, bias_f32)


def conv3x3_bn_relu(x_nhwc, w9, bias, out_ch, *, row_tile=8, block_tiles=2):
    """x_nhwc: (N,H,W,Cin_cat); w9: (9, Cin_p, Cout_p) bf16 (BN pre-folded)."""
    n, h, w, cin = x_nhwc.shape
    _, cin_p, cout_p = w9.shape
    assert h % row_tile == 0, "TODO(synk): pad H to a row_tile multiple"
    num_tiles = h // row_tile
    block_tiles = max(1, min(block_tiles, num_tiles))
    while num_tiles % block_tiles:
        block_tiles -= 1
    num_blocks = num_tiles // block_tiles

    wp = w + 2
    m_rows = row_tile * wp                       # matmul M per inner tile
    block_rows = block_tiles * m_rows            # output rows per grid step
    data_rows = (row_tile + 2) * wp              # halo rows DMA'd per tile
    buf_rows = _round_up(data_rows + 2, 16)      # +2 slack for the last tap

    # bf16 cast + spatial pad + channel pad in one pre-kernel glue pass.
    xpad = jnp.pad(x_nhwc.astype(jnp.bfloat16),
                   ((0, 0), (1, 1), (1, 1), (0, cin_p - cin)))
    xflat = xpad.reshape(n, (h + 2) * wp, cin_p)

    # Resident VMEM budget: weight slab + bias (+double buffers), output block
    # (double-buffered by the pipeline), halo double-buffer, plus headroom.
    vmem_bytes = (2 * (9 * cin_p * cout_p * 2)
                  + 2 * (block_rows * cout_p * 2)
                  + 2 * buf_rows * cin_p * 2
                  + 2 * cout_p * 4)
    vmem_limit = int(min(100 * 1024 * 1024, vmem_bytes + (8 << 20)))

    kernel = _make_conv3x3_kernel(block_tiles, wp, cin_p,
                                  m_rows, data_rows, buf_rows)
    out_flat = pl.pallas_call(
        kernel,
        out_shape=jax.ShapeDtypeStruct((n, h * wp, cout_p), jnp.bfloat16),
        grid=(n, num_blocks),
        in_specs=[
            pl.BlockSpec(memory_space=pl.ANY),                  # manual halo DMA
            pl.BlockSpec((9, cin_p, cout_p), lambda b, r: (0, 0, 0)),  # resident
            pl.BlockSpec((1, cout_p), lambda b, r: (0, 0)),
        ],
        out_specs=pl.BlockSpec((None, block_rows, cout_p),
                               lambda b, r: (b, r, 0)),
        scratch_shapes=[
            pltpu.VMEM((2, buf_rows, cin_p), jnp.bfloat16),     # halo dbl-buffer
            pltpu.SemaphoreType.DMA((2,)),
        ],
        compiler_params=pltpu.CompilerParams(
            dimension_semantics=("parallel", "parallel"),
            vmem_limit_bytes=vmem_limit),
    )(xflat, w9, bias)

    # Drop the 2 over-computed columns per image row and the Cout padding.
    # TODO(synk): store only the valid W columns / out_ch channels from the
    # kernel to avoid this post-slice copy when Cout_p >> out_ch.
    return out_flat.reshape(n, h, wp, cout_p)[:, :, :w, :out_ch]


# ----------------------------------------------------------------------------
# Plain-JAX glue (adaptive pooling, bilinear resize) -- PyTorch semantics
# ----------------------------------------------------------------------------
def adaptive_avg_pool_nhwc(x, bin_sz):
    _, h, w, _ = x.shape
    rows = []
    for i in range(bin_sz):
        hs = (i * h) // bin_sz
        he = -((-(i + 1) * h) // bin_sz)
        cols = []
        for j in range(bin_sz):
            ws = (j * w) // bin_sz
            we = -((-(j + 1) * w) // bin_sz)
            cols.append(jnp.mean(x[:, hs:he, ws:we, :], axis=(1, 2)))
        rows.append(jnp.stack(cols, axis=1))
    return jnp.stack(rows, axis=1)  # (N, bin, bin, C)


def bilinear_resize_nhwc(x, out_h, out_w):
    _, h, w, _ = x.shape

    def src_index(out_size, in_size):
        scale = in_size / out_size
        idx = (jnp.arange(out_size, dtype=jnp.float32) + 0.5) * scale - 0.5
        idx = jnp.maximum(idx, 0.0)
        i0 = jnp.minimum(jnp.floor(idx).astype(jnp.int32), in_size - 1)
        i1 = jnp.minimum(i0 + 1, in_size - 1)
        frac = jnp.clip(idx - i0.astype(jnp.float32), 0.0, 1.0)
        return i0, i1, frac

    r0, r1, rf = src_index(out_h, h)
    c0, c1, cf = src_index(out_w, w)
    cfb = cf[None, None, :, None]
    top = x[:, r0][:, :, c0] * (1.0 - cfb) + x[:, r0][:, :, c1] * cfb
    bot = x[:, r1][:, :, c0] * (1.0 - cfb) + x[:, r1][:, :, c1] * cfb
    rfb = rf[None, :, None, None]
    return top * (1.0 - rfb) + bot * rfb


# ----------------------------------------------------------------------------
# Parameters (kaiming_uniform fan_in/relu, like the PyTorch module)
# ----------------------------------------------------------------------------
def _kaiming_uniform(key, shape_oihw):
    fan_in = shape_oihw[1] * shape_oihw[2] * shape_oihw[3]
    bound = math.sqrt(2.0) * math.sqrt(3.0 / fan_in)
    return jax.random.uniform(key, shape_oihw, jnp.float32, -bound, bound)


def init_psp_params(key, in_channels, bin_sizes):
    """Raw f32 parameters matching the PyTorch module at initialization."""
    out_ch = in_channels // len(bin_sizes)
    keys = jax.random.split(key, len(bin_sizes) + 1)
    stage_w = []
    for i in range(len(bin_sizes)):
        w = _kaiming_uniform(keys[i], (out_ch, in_channels, 1, 1))
        stage_w.append(jnp.transpose(w[:, :, 0, 0], (1, 0)))        # (Cin, out_ch)
    cin_cat = in_channels + out_ch * len(bin_sizes)
    wb = _kaiming_uniform(keys[-1], (out_ch, cin_cat, 3, 3))        # OIHW
    wb_hwio = jnp.transpose(wb, (2, 3, 1, 0))                       # (3,3,Cin,Out)
    return dict(bin_sizes=tuple(bin_sizes), in_channels=in_channels,
                out_ch=out_ch, stage_w=stage_w, wb_hwio=wb_hwio)


def prepare_kernel_params(raw, *, row_tile=8, block_tiles=2):
    """Fold BN scale, pad channels to 128 lanes, cast matmul operands to bf16."""
    bins = raw["bin_sizes"]
    out_ch = raw["out_ch"]
    cin = raw["in_channels"]

    # Stage 1x1 convs: weights of all stages concatenated along Cout.
    cin_s_p = _round_up(cin, _LANE)
    w_stage = jnp.concatenate(raw["stage_w"], axis=1) * _BN_SCALE   # (Cin, S*out)
    cout_s_p = _round_up(w_stage.shape[1], _LANE)
    w_stage = jnp.pad(w_stage, ((0, cin_s_p - cin),
                                (0, cout_s_p - w_stage.shape[1])))
    b_stage = jnp.zeros((1, cout_s_p), jnp.float32)

    # Bottleneck 3x3 conv: (3,3,Cin_cat,out_ch) -> (9, Cin_p, Cout_p) tap stack.
    wb = raw["wb_hwio"] * _BN_SCALE
    cin_cat = wb.shape[2]
    cin_b_p = _round_up(cin_cat, _LANE)
    cout_b_p = _round_up(out_ch, _LANE)
    wb = jnp.pad(wb, ((0, 0), (0, 0),
                      (0, cin_b_p - cin_cat), (0, cout_b_p - out_ch)))
    w_bneck = wb.reshape(9, cin_b_p, cout_b_p)
    b_bneck = jnp.zeros((1, cout_b_p), jnp.float32)

    return dict(bin_sizes=bins, out_ch=out_ch, cin_stage_p=cin_s_p,
                w_stage=w_stage.astype(jnp.bfloat16), b_stage=b_stage,
                w_bneck=w_bneck.astype(jnp.bfloat16), b_bneck=b_bneck,
                row_tile=row_tile, block_tiles=block_tiles)


# ----------------------------------------------------------------------------
# Forward pass (accepts / returns NCHW like the PyTorch module)
# ----------------------------------------------------------------------------
def psp_module_forward(features_nchw, kp):
    x = jnp.transpose(features_nchw, (0, 2, 3, 1)).astype(jnp.float32)  # NHWC
    n, h, w, c = x.shape
    bins = kp["bin_sizes"]
    out_ch = kp["out_ch"]
    cin_sp = kp["cin_stage_p"]

    # ---- pyramid stages: pool all bins, pack rows, one fused Pallas matmul
    pooled_rows = [adaptive_avg_pool_nhwc(x, b).reshape(n * b * b, c)
                   for b in bins]
    rows = jnp.concatenate(pooled_rows, axis=0)
    m = rows.shape[0]
    m_p = _round_up(m, 16)                                 # bf16 sublane packing
    rows_p = jnp.pad(rows, ((0, m_p - m), (0, cin_sp - c))).astype(jnp.bfloat16)
    y_all = fused_stage_conv1x1(rows_p, kp["w_stage"], kp["b_stage"])

    # ---- upsample each tiny stage map, concat with features in bf16
    pyramids = [x.astype(jnp.bfloat16)]
    off = 0
    for s, b in enumerate(bins):
        cnt = n * b * b
        ys = y_all[off:off + cnt, s * out_ch:(s + 1) * out_ch]
        off += cnt
        up = bilinear_resize_nhwc(ys.reshape(n, b, b, out_ch), h, w)
        pyramids.append(up.astype(jnp.bfloat16))
    # TODO(synk): fuse the tiny upsampled stage maps + concat into the 3x3-conv
    # input DMA to avoid materializing the full-res concat in HBM.
    cat = jnp.concatenate(pyramids, axis=-1)               # bf16 (N,H,W,C+out*S)

    out = conv3x3_bn_relu(cat, kp["w_bneck"], kp["b_bneck"], out_ch,
                          row_tile=kp["row_tile"], block_tiles=kp["block_tiles"])
    return jnp.transpose(out, (0, 3, 1, 2)).astype(jnp.float32)   # NCHW f32


# ----------------------------------------------------------------------------
# Pure-JAX f32 reference (for correctness check)
# ----------------------------------------------------------------------------
def psp_forward_reference(features_nchw, raw):
    x = jnp.transpose(features_nchw, (0, 2, 3, 1)).astype(jnp.float32)
    _, h, w, _ = x.shape
    outs = [x]
    for b, wst in zip(raw["bin_sizes"], raw["stage_w"]):
        p = adaptive_avg_pool_nhwc(x, b)
        y = jnp.maximum(jnp.einsum("nijc,cd->nijd", p, wst) * _BN_SCALE, 0.0)
        outs.append(bilinear_resize_nhwc(y, h, w))
    cat = jnp.concatenate(outs, axis=-1)
    conv = jax.lax.conv_general_dilated(
        cat, raw["wb_hwio"], window_strides=(1, 1), padding="SAME",
        dimension_numbers=("NHWC", "HWIO", "NHWC"))
    out = jnp.maximum(conv * _BN_SCALE, 0.0)
    return jnp.transpose(out, (0, 3, 1, 2))


# ----------------------------------------------------------------------------
if __name__ == "__main__":
    key = jax.random.PRNGKey(0)
    k_param, k_x = jax.random.split(key)

    N, C, H, W = 2, 8, 16, 16
    BIN_SIZES = (1, 2, 3, 6)

    raw = init_psp_params(k_param, C, BIN_SIZES)
    kp = prepare_kernel_params(raw, row_tile=8, block_tiles=2)
    x = jax.random.normal(k_x, (N, C, H, W), dtype=jnp.float32)

    out = psp_module_forward(x, kp)
    out = jax.block_until_ready(out)

    out_ch = C // len(BIN_SIZES)
    assert out.shape == (N, out_ch, H, W), out.shape
    assert bool(jnp.all(jnp.isfinite(out)))

    ref = psp_forward_reference(x, raw)
    max_err = float(jnp.max(jnp.abs(out - ref)))
    assert max_err < 0.1, f"mismatch vs reference: {max_err}"

    print("KERNEL_OK")
</pallas_src>

<mosaic_0001>
module attributes {stable_mosaic.version = 11 : i64} {
  func.func @_mm_bias_relu_kernel(%arg0: i32, %arg1: memref<112x128xbf16, #tpu.memory_space<vmem>>, %arg2: memref<128x128xbf16, #tpu.memory_space<vmem>>, %arg3: memref<1x128xf32, #tpu.memory_space<vmem>>, %arg4: memref<112x128xf32, #tpu.memory_space<vmem>>) attributes {dimension_semantics = [#tpu.dimension_semantics<arbitrary>], iteration_bounds = array<i64: 1>, scalar_prefetch = 0 : i64, scratch_operands = 0 : i64, tpu.core_type = #tpu.core_type<tc>, window_params = [{pipeline_mode = #tpu.pipeline_mode<synchronous>, transform_indices = @transform_0, window_bounds = array<i64: 112, 128>}, {pipeline_mode = #tpu.pipeline_mode<synchronous>, transform_indices = @transform_1, window_bounds = array<i64: 128, 128>}, {pipeline_mode = #tpu.pipeline_mode<synchronous>, transform_indices = @transform_2, window_bounds = array<i64: 1, 128>}, {pipeline_mode = #tpu.pipeline_mode<synchronous>, transform_indices = @transform_3, window_bounds = array<i64: 112, 128>}]} {
    %c0 = arith.constant 0 : index
    %c0_0 = arith.constant 0 : index
    %0 = vector.load %arg1[%c0, %c0_0] : memref<112x128xbf16, #tpu.memory_space<vmem>>, vector<112x128xbf16>
    %c0_1 = arith.constant 0 : index
    %c0_2 = arith.constant 0 : index
    %1 = vector.load %arg2[%c0_1, %c0_2] : memref<128x128xbf16, #tpu.memory_space<vmem>>, vector<128x128xbf16>
    %cst = arith.constant dense<0.000000e+00> : vector<112x128xf32>
    %2 = tpu.matmul %0, %1, %cst {dimension_numbers = #tpu.dot_dimension_numbers<[1], [0], [0], [1], [0, 0, 1, 1], [], []>} : vector<112x128xbf16>, vector<128x128xbf16>, vector<112x128xf32> -> vector<112x128xf32>
    %c0_3 = arith.constant 0 : index
    %c0_4 = arith.constant 0 : index
    %3 = vector.load %arg3[%c0_3, %c0_4] : memref<1x128xf32, #tpu.memory_space<vmem>>, vector<1x128xf32>
    %4 = vector.broadcast %3 : vector<1x128xf32> to vector<112x128xf32>
    %5 = arith.addf %2, %4 : vector<112x128xf32>
    %cst_5 = arith.constant 0.000000e+00 : f32
    %6 = vector.broadcast %cst_5 : f32 to vector<112x128xf32>
    %7 = arith.maximumf %5, %6 : vector<112x128xf32>
    %c0_6 = arith.constant 0 : index
    %c0_7 = arith.constant 0 : index
    %8 = vector.load %arg4[%c0_6, %c0_7] : memref<112x128xf32, #tpu.memory_space<vmem>>, vector<112x128xf32>
    tpu.vector_store %arg4[%c0_6, %c0_7], %7 {strides = array<i32>} : memref<112x128xf32, #tpu.memory_space<vmem>>, vector<112x128xf32>,
    return
  }
  func.func @transform_0(%arg0: i32) -> (i32, i32) {
    %c0_i32 = arith.constant 0 : i32
    %c0_i32_0 = arith.constant 0 : i32
    %c0_i32_1 = arith.constant 0 : i32
    return %c0_i32, %c0_i32_0 : i32, i32
  }
  func.func @transform_1(%arg0: i32) -> (i32, i32) {
    %c0_i32 = arith.constant 0 : i32
    %c0_i32_0 = arith.constant 0 : i32
    %c0_i32_1 = arith.constant 0 : i32
    return %c0_i32, %c0_i32_0 : i32, i32
  }
  func.func @transform_2(%arg0: i32) -> (i32, i32) {
    %c0_i32 = arith.constant 0 : i32
    %c0_i32_0 = arith.constant 0 : i32
    %c0_i32_1 = arith.constant 0 : i32
    return %c0_i32, %c0_i32_0 : i32, i32
  }
  func.func @transform_3(%arg0: i32) -> (i32, i32) {
    %c0_i32 = arith.constant 0 : i32
    %c0_i32_0 = arith.constant 0 : i32
    %c0_i32_1 = arith.constant 0 : i32
    return %c0_i32, %c0_i32_0 : i32, i32
  }
}

</mosaic_0001>

<bundles_post_ra>
// kernel: tpu_custom_call.1
= control target key start
LH: loop header
LB: loop body
LE: loop exit
PB: predicated region body
PF: predicated region fallthrough
CT: control target
= control target key end

     0   :  { %8 = vsyncpa [#allocation3], 0  ;;  %s551_s0 = inlined_call_operand.hbm [shape: bf16[112,128], index: 0, kind: input, shape index: {}]   ;;  %s552_s1 = inlined_call_operand.hbm [shape: bf16[128,128], index: 1, kind: input, shape index: {}]   ;;  %s553_s2 = inlined_call_operand.vmem [shape: f32[1,128], index: 2, kind: input, shape index: {}]   ;;  %s554_s3 = inlined_call_operand.hbm [shape: f32[112,128], index: 3, kind: output, shape index: {}]  }
   0x1   :  { %9 = vsyncpa [#allocation6], 0 }
   0x2   :  { %10 = vsyncpa [#allocation4], 0  ;;  %s487_s12 = smov [#allocation2]  }
   0x3   :  { %s16_s13 = sshll.u32 %s487_s12, 4  ;;  %s17_s13 = int_to_ptr.vmem [resolvable:$true] %s16_s13 }
   0x4   :  { %s429_s14 = scalar_lea.vmem %s17_s13, 896  ;;  %p434_p1 = scmp.lt.s32.totalorder %s17_s13, %s17_s13 }
   0x5   :  { %p430_p0 = scmp.ne.s32.totalorder %s17_s13, %s429_s14  ;;  %p435_p2 = scmp.lt.s32.totalorder %s429_s14, %s429_s14 }
   0x7   :  { %p436_p3 = por %p435_p2, %p434_p1 }
   0x9   :  { %p437_p4 = pnand %p436_p3, %p430_p0 }
   0xb   :  { %440 = shalt.err (!%p437_p4)
}
   0xc   :  { %s488_s15 = smov 64   ;;  %s489_s16 = smov 4  }
   0xd   :  { %22 = dma.hbm_to_vmem [thread:$0]  %s551_s0, 896, %s17_s13, [#allocation3], %s488_s15, %s488_s15, %s489_s16  }
   0xe   :  { %s490_s19 = smov [#allocation5]  }
   0xf   :  { %s28_s20 = sshll.u32 %s490_s19, 4  ;;  %s29_s20 = int_to_ptr.vmem [resolvable:$true] %s28_s20 }
  0x10   :  { %s449_s21 = scalar_lea.vmem %s29_s20, 1024  ;;  %p454_p6 = scmp.lt.s32.totalorder %s29_s20, %s29_s20 }
  0x11   :  { %p450_p5 = scmp.ne.s32.totalorder %s29_s20, %s449_s21  ;;  %p455_p7 = scmp.lt.s32.totalorder %s449_s21, %s449_s21 }
  0x13   :  { %p456_p8 = por %p455_p7, %p454_p6 }
  0x15   :  { %p457_p9 = pnand %p456_p8, %p450_p5 }
  0x17   :  { %460 = shalt.err (!%p457_p9)
}
  0x18   :  { %34 = dma.hbm_to_vmem [thread:$0]  %s552_s1, 1024, %s29_s20, [#allocation6], %s488_s15, %s488_s15, %s489_s16  }
  0x19   :  { %481 = dma.done.wait [#allocation3], 896  }
  0x1a   :  { %482 = vsyncadd [#allocation3], 4294966400 }
  0x1b   :  { %483 = dma.done.wait [#allocation6], 1024  }
  0x1c   :  { %484 = vsyncadd [#allocation6], 4294966272  ;;  %v491_v0 = vmov 0.0   ;;  %vm492_vm0 = vmmov 0   ;;  %v406_v1 = vld [vmem:[#allocation5 + $0x38] sm:$0xff]   ;;  %v407_v2 = vld [vmem:[#allocation5 + $0x30] sm:$0xff]  }
  0x1d   :  { %337 = vmatprep.subr.bf16.mxu0 %v491_v0  ;;  %381 = vmatprep.subr.bf16.mxu1 %v491_v0  ;;  %v408_v3 = vld [vmem:[#allocation5 + $0x28] sm:$0xff]   ;;  %v409_v4 = vld [vmem:[#allocation5 + $0x20] sm:$0xff]   ;;  %v410_v5 = vld [vmem:[#allocation5 + $0x18] sm:$0xff]  }
  0x1e   :  { %353 = vmatprep.mubr.msk.bf16.mxu0 %vm492_vm0, %v491_v0  ;;  %369 = vmatprep.mubr.msk.bf16.mxu1 %vm492_vm0, %v491_v0  ;;  %v411_v6 = vld [vmem:[#allocation5 + $0x10] sm:$0xff]   ;;  %v412_v7 = vld [vmem:[#allocation5 + $0x8] sm:$0xff]   ;;  %v413_v8 = vld [vmem:[#allocation5] sm:$0xff]  }
  0x1f   :  { %338 = vmatpush3.bf16.msra.mxu0 %v406_v1  ;;  %389 = vmatpush3.bf16.msra.mxu1 %v406_v1  ;;  %v414_v9 = vld [vmem:[#allocation2] sm:$0xff]   ;;  %v416_v11 = vld [vmem:[#allocation2 + $0x8] sm:$0xff]   ;;  %v418_v13 = vld [vmem:[#allocation2 + $0x10] sm:$0xff]  }
  0x20   :  { %339 = vmatprep.subr.bf16.mxu0 %v491_v0  ;;  %382 = vmatprep.subr.bf16.mxu1 %v491_v0  ;;  %v415_v10 = vld [vmem:[#allocation2 + $0x20] sm:$0xff]   ;;  %v417_v12 = vld [vmem:[#allocation2 + $0x28] sm:$0xff]   ;;  %v419_v14 = vld [vmem:[#allocation2 + $0x30] sm:$0xff]  }
  0x21   :  { %v420_v15 = vld [vmem:[#allocation2 + $0x18] sm:$0xff]   ;;  %v532_v16 = vld [vmem:[%s553_s2] ss:$0 sm:$0xff]  ;;  %s493_s2 = smov [#allocation7]  }
  0x22   :  { %s293_s24 = sshll.u32 %s493_s2, 4  ;;  %s294_s24 = int_to_ptr.vmem [resolvable:$true] %s293_s24 }
  0x23   :  { %340 = vmatpush3.bf16.msra.mxu0 %v407_v2  ;;  %390 = vmatpush3.bf16.msra.mxu1 %v407_v2  ;;  %s461_s25 = scalar_lea.vmem %s294_s24, 1792  ;;  %p466_p11 = scmp.lt.s32.totalorder %s294_s24, %s294_s24 }
  0x24   :  { %341 = vmatprep.subr.bf16.mxu0 %v491_v0  ;;  %383 = vmatprep.subr.bf16.mxu1 %v491_v0  ;;  %p462_p10 = scmp.ne.s32.totalorder %s294_s24, %s461_s25  ;;  %p467_p12 = scmp.lt.s32.totalorder %s461_s25, %s461_s25 }
  0x26   :  { %p468_p13 = por %p467_p12, %p466_p11 }
  0x27   :  { %342 = vmatpush3.bf16.msra.mxu0 %v408_v3  ;;  %391 = vmatpush3.bf16.msra.mxu1 %v408_v3 }
  0x28   :  { %343 = vmatprep.subr.bf16.mxu0 %v491_v0  ;;  %384 = vmatprep.subr.bf16.mxu1 %v491_v0  ;;  %p469_p0 = pnand %p468_p13, %p462_p10 }
  0x2b   :  { %344 = vmatpush3.bf16.msra.mxu0 %v409_v4  ;;  %392 = vmatpush3.bf16.msra.mxu1 %v409_v4 }
  0x2c   :  { %345 = vmatprep.subr.bf16.mxu0 %v491_v0  ;;  %385 = vmatprep.subr.bf16.mxu1 %v491_v0 }
  0x2f   :  { %346 = vmatpush3.bf16.msra.mxu0 %v410_v5  ;;  %393 = vmatpush3.bf16.msra.mxu1 %v410_v5 }
  0x30   :  { %347 = vmatprep.subr.bf16.mxu0 %v491_v0  ;;  %386 = vmatprep.subr.bf16.mxu1 %v491_v0 }
  0x33   :  { %348 = vmatpush3.bf16.msra.mxu0 %v411_v6  ;;  %394 = vmatpush3.bf16.msra.mxu1 %v411_v6 }
  0x34   :  { %349 = vmatprep.subr.bf16.mxu0 %v491_v0  ;;  %387 = vmatprep.subr.bf16.mxu1 %v491_v0 }
  0x37   :  { %350 = vmatpush3.bf16.msra.mxu0 %v412_v7  ;;  %395 = vmatpush3.bf16.msra.mxu1 %v412_v7 }
  0x38   :  { %351 = vmatprep.subr.bf16.mxu0 %v491_v0  ;;  %388 = vmatprep.subr.bf16.mxu1 %v491_v0 }
  0x3b   :  { %352 = vmatpush3.bf16.msra.mxu0 %v413_v8  ;;  %396 = vmatpush3.bf16.msra.mxu1 %v413_v8 }
  0x3e   :  { %354 = vmatmul.mubr.bf16.vlgmr.msra.gmra.mxu0 %v414_v9  ;;  %370 = vmatmul.mubr.bf16.vlgmr.msra.gmra.mxu1 %v415_v10 }
  0x3f   :  { %357 = vmatprep.mubr.msk.bf16.mxu0 %vm492_vm0, %v491_v0  ;;  %373 = vmatprep.mubr.msk.bf16.mxu1 %vm492_vm0, %v491_v0 }
  0x46   :  { %358 = vmatmul.mubr.bf16.gmra.mxu0 %v416_v11  ;;  %374 = vmatmul.mubr.bf16.gmra.mxu1 %v417_v12 }
  0x47   :  { %361 = vmatprep.mubr.msk.bf16.mxu0 %vm492_vm0, %v491_v0  ;;  %377 = vmatprep.mubr.msk.bf16.mxu1 %vm492_vm0, %v491_v0 }
  0x4e   :  { %362 = vmatmul.mubr.bf16.gmra.mxu0 %v418_v13  ;;  %378 = vmatmul.mubr.bf16.gmra.mxu1 %v419_v14 }
  0x4f   :  { %365 = vmatprep.mubr.msk.bf16.mxu0 %vm492_vm0, %v491_v0 }
  0x56   :  { %366 = vmatmul.mubr.bf16.gmra.mxu0 %v420_v15 }
  0xfe   :  { %v205_v17 = vpop.f32.mrf.mxu0  ;;  %v237_v18 = vpop.f32.mrf.mxu1 }
  0xff   :  { %v206_v19 = vadd.f32 %v532_v16, %v205_v17  ;;  %v238_v20 = vadd.f32 %v532_v16, %v237_v18 }
 0x100   :  { %v355_v21 = vpop.f32.mrf.mxu0  ;;  %v371_v22 = vpop.f32.mrf.mxu1 }
 0x101   :  { %v260_v23 = vmax.f32 %v206_v19, 0.0  ;;  %v268_v24 = vmax.f32 %v238_v20, 0.0 }
 0x102   :  { %v208_v25 = vpop.f32.mrf.mxu0  ;;  %v240_v26 = vpop.f32.mrf.mxu1 }
 0x103   :  { %274 = vst [vmem:[#allocation7] sm:$0xff] %v260_v23  ;;  %282 = vst [vmem:[#allocation7 + $0x40] sm:$0xff] %v268_v24  ;;  %v209_v27 = vadd.f32 %v532_v16, %v208_v25  ;;  %v241_v28 = vadd.f32 %v532_v16, %v240_v26 }
 0x104   :  { %v356_v29 = vpop.f32.mrf.mxu0  ;;  %v372_v30 = vpop.f32.mrf.mxu1 }
 0x105   :  { %v261_v31 = vmax.f32 %v209_v27, 0.0  ;;  %v269_v32 = vmax.f32 %v241_v28, 0.0 }
 0x106   :  { %v213_v33 = vpop.f32.mrf.mxu0  ;;  %v245_v34 = vpop.f32.mrf.mxu1 }
 0x107   :  { %275 = vst [vmem:[#allocation7 + $0x8] sm:$0xff] %v261_v31  ;;  %283 = vst [vmem:[#allocation7 + $0x48] sm:$0xff] %v269_v32  ;;  %v214_v35 = vadd.f32 %v532_v16, %v213_v33  ;;  %v246_v36 = vadd.f32 %v532_v16, %v245_v34 }
 0x108   :  { %v359_v37 = vpop.f32.mrf.mxu0  ;;  %v375_v38 = vpop.f32.mrf.mxu1 }
 0x109   :  { %v262_v39 = vmax.f32 %v214_v35, 0.0  ;;  %v270_v40 = vmax.f32 %v246_v36, 0.0 }
 0x10a   :  { %v216_v41 = vpop.f32.mrf.mxu0  ;;  %v248_v42 = vpop.f32.mrf.mxu1 }
 0x10b   :  { %276 = vst [vmem:[#allocation7 + $0x10] sm:$0xff] %v262_v39  ;;  %284 = vst [vmem:[#allocation7 + $0x50] sm:$0xff] %v270_v40  ;;  %v217_v43 = vadd.f32 %v532_v16, %v216_v41  ;;  %v249_v44 = vadd.f32 %v532_v16, %v248_v42 }
 0x10c   :  { %v360_v45 = vpop.f32.mrf.mxu0  ;;  %v376_v46 = vpop.f32.mrf.mxu1 }
 0x10d   :  { %v263_v47 = vmax.f32 %v217_v43, 0.0  ;;  %v271_v48 = vmax.f32 %v249_v44, 0.0 }
 0x10e   :  { %v221_v49 = vpop.f32.mrf.mxu0  ;;  %v253_v50 = vpop.f32.mrf.mxu1 }
 0x10f   :  { %277 = vst [vmem:[#allocation7 + $0x18] sm:$0xff] %v263_v47  ;;  %285 = vst [vmem:[#allocation7 + $0x58] sm:$0xff] %v271_v48  ;;  %v222_v51 = vadd.f32 %v532_v16, %v221_v49  ;;  %v254_v52 = vadd.f32 %v532_v16, %v253_v50 }
 0x110   :  { %v363_v53 = vpop.f32.mrf.mxu0  ;;  %v379_v54 = vpop.f32.mrf.mxu1 }
 0x111   :  { %v264_v55 = vmax.f32 %v222_v51, 0.0  ;;  %v272_v56 = vmax.f32 %v254_v52, 0.0 }
 0x112   :  { %v224_v57 = vpop.f32.mrf.mxu0  ;;  %v256_v58 = vpop.f32.mrf.mxu1 }
 0x113   :  { %278 = vst [vmem:[#allocation7 + $0x20] sm:$0xff] %v264_v55  ;;  %286 = vst [vmem:[#allocation7 + $0x60] sm:$0xff] %v272_v56  ;;  %v225_v59 = vadd.f32 %v532_v16, %v224_v57  ;;  %v257_v60 = vadd.f32 %v532_v16, %v256_v58 }
 0x114   :  { %v364_v61 = vpop.f32.mrf.mxu0  ;;  %v380_v62 = vpop.f32.mrf.mxu1 }
 0x115   :  { %v265_v63 = vmax.f32 %v225_v59, 0.0  ;;  %v273_v0 = vmax.f32 %v257_v60, 0.0 }
 0x116   :  { %v229_v1 = vpop.f32.mrf.mxu0 }
 0x117   :  { %279 = vst [vmem:[#allocation7 + $0x28] sm:$0xff] %v265_v63  ;;  %287 = vst [vmem:[#allocation7 + $0x68] sm:$0xff] %v273_v0  ;;  %v230_v2 = vadd.f32 %v532_v16, %v229_v1 }
 0x118   :  { %v367_v3 = vpop.f32.mrf.mxu0 }
 0x119   :  { %v266_v4 = vmax.f32 %v230_v2, 0.0 }
 0x11a   :  { %v232_v5 = vpop.f32.mrf.mxu0 }
 0x11b   :  { %280 = vst [vmem:[#allocation7 + $0x30] sm:$0xff] %v266_v4  ;;  %v233_v6 = vadd.f32 %v532_v16, %v232_v5 }
 0x11c   :  { %v368_v7 = vpop.f32.mrf.mxu0 }
 0x11d   :  { %v267_v8 = vmax.f32 %v233_v6, 0.0 }
 0x11f   :  { %281 = vst [vmem:[#allocation7 + $0x38] sm:$0xff] %v267_v8 }
 0x120   :  { %472 = shalt.err (!%p469_p0)
}
 0x121   :  { %s494_s26 = smov 128   ;;  %s495_s27 = smov 8  }
 0x122   :  { %299 = dma.vmem_to_hbm [thread:$0]  %s294_s24, 1792, %s554_s3, [#allocation4], %s494_s26, %s494_s26, %s495_s27  }
 0x123   :  { %485 = dma.done.wait [#allocation4], 1792  }
 0x124   :  { %486 = vsyncadd [#allocation4], 4294965504 }
 0x125   :  { %303 = vsyncpa [#allocation3], 1 }
 0x126   :  { %304 = vsyncpa [#allocation6], 1 }
 0x127   :  { %305 = vsyncpa [#allocation4], 1 }

</bundles_post_ra>
